<compile_context>
chip_gen: v5e
topology: v5e:2x2
jax: 0.10.0
libtpu: 0.0.40
codegen_flags: <defaults>
</compile_context>

<pallas_src>
import functools

import jax
import jax.numpy as jnp
from jax.experimental import pallas as pl
from jax.experimental.pallas import tpu as pltpu


def _round_up(x: int, m: int) -> int:
    return (x + m - 1) // m * m


def _vmem_capacity_bytes() -> int:
    """Per-core VMEM capacity; conservative 64 MiB fallback (v7x per-TC)."""
    try:
        cap = int(pltpu.get_tpu_info().vmem_capacity_bytes)
        if cap > 0:
            return cap
    except Exception:
        pass
    return 64 << 20


# ---------------------------------------------------------------------------
# Kernels
# ---------------------------------------------------------------------------

def _highway_kernel_resident(x_ref, w_ref, b_ref, o_ref, *, d_pad, mm_dtype):
    """Fused weights fully VMEM-resident; one MXU pass per row tile."""
    x = x_ref[...]
    x_mm = x if x.dtype == mm_dtype else x.astype(mm_dtype)

    # Single [TM, Dp] @ [Dp, 2*Dp] MXU pass covering both Linear layers.
    acc = jnp.dot(x_mm, w_ref[...], preferred_element_type=jnp.float32)
    acc = acc + b_ref[...].astype(jnp.float32)

    proj_gate = jnp.maximum(acc[:, :d_pad], 0.0)      # ReLU(x Wp + bp)
    t_gate = jax.nn.sigmoid(acc[:, d_pad:])           # sigmoid(x Wt + bt)
    x_f32 = x.astype(jnp.float32)                     # residual stays f32
    y = proj_gate * t_gate + x_f32 * (1.0 - t_gate)
    o_ref[...] = y.astype(o_ref.dtype)


def _highway_kernel_ktiled(x_row_ref, w_ref, b_ref, o_ref, acc_ref,
                           *, d_pad, tk, mm_dtype):
    """Large-D path: stream K-slabs of the fused weights, f32 accumulator.

    x is DMA'd once per row tile; the MXU LHS K-chunk is a 128-aligned slice
    of the resident row block (no duplicate x traffic).
    """
    k = pl.program_id(1)

    @pl.when(k == 0)
    def _init():
        # Fold the bias add into the accumulator init (one broadcast / tile).
        acc_ref[...] = jnp.broadcast_to(b_ref[...].astype(jnp.float32),
                                        acc_ref.shape)

    off = pl.multiple_of(k * tk, 128)
    x_k = x_row_ref[:, pl.ds(off, tk)]
    x_k = x_k if x_k.dtype == mm_dtype else x_k.astype(mm_dtype)
    acc_ref[...] += jnp.dot(x_k, w_ref[...], preferred_element_type=jnp.float32)

    @pl.when(k == pl.num_programs(1) - 1)
    def _finalize():
        acc = acc_ref[...]
        proj_gate = jnp.maximum(acc[:, :d_pad], 0.0)
        t_gate = jax.nn.sigmoid(acc[:, d_pad:])
        x_f32 = x_row_ref[...].astype(jnp.float32)
        y = proj_gate * t_gate + x_f32 * (1.0 - t_gate)
        o_ref[...] = y.astype(o_ref.dtype)


# ---------------------------------------------------------------------------
# Wrapper
# ---------------------------------------------------------------------------

def prepare_highway_params(w_proj, b_proj, w_transform, b_transform, *,
                           matmul_dtype=None):
    """Fuse the two nn.Linear layers into one padded RHS / bias row.

    PyTorch Linear is x @ W.T + b: pre-transpose, pad to lane multiples and
    fuse both projections into one [Dp, 2*Dp] RHS and a [1, 2*Dp] f32 bias.
    Call once (outside the step function) so the fusion is not rebuilt per step.
    """
    d = w_proj.shape[0]
    d_pad = _round_up(d, 128)

    def _pad_w(w):
        return jnp.pad(w.T, ((0, d_pad - d), (0, d_pad - d)))

    w_cat = jnp.concatenate([_pad_w(w_proj), _pad_w(w_transform)], axis=1)
    if matmul_dtype is not None:
        w_cat = w_cat.astype(matmul_dtype)
    b_cat = jnp.concatenate([
        jnp.pad(b_proj.astype(jnp.float32), (0, d_pad - d)),
        jnp.pad(b_transform.astype(jnp.float32), (0, d_pad - d)),
    ]).reshape(1, 2 * d_pad)
    return w_cat, b_cat


def highway_apply(x, w_cat, b_cat, *, row_tile=512, k_tile=None):
    """Apply the Highway layer given pre-fused params (see prepare_highway_params).

    row_tile: rows per grid step (512 default works on v5e/v6e/v7x; the
              footprint-based budget below shrinks it automatically on v7x).
    k_tile:   None = auto (weights resident when they fit, else stream K-slabs).
    """
    orig_shape = x.shape
    d = orig_shape[-1]
    d_pad = w_cat.shape[0]
    assert w_cat.shape == (d_pad, 2 * d_pad), "w_cat must be [Dp, 2*Dp]"
    assert d_pad == _round_up(d, 128), "w_cat padding inconsistent with x"

    x2 = x.reshape(-1, d)
    n = x2.shape[0]

    mm_dtype = w_cat.dtype
    xb = x2.dtype.itemsize
    ob = xb
    wb = w_cat.dtype.itemsize

    vmem_cap = _vmem_capacity_bytes()
    budget = int(0.75 * vmem_cap)

    # Row tile: multiple of 8 sublanes; keep >= 2 grid steps when N allows so
    # the "parallel" axis can shard across both v7x TensorCores.
    tm = max(8, min(_round_up(int(row_tile), 8), _round_up(n, 8)))
    if n > 8:
        tm = min(tm, max(8, _round_up(-(-n // 2), 8)))

    w_bytes = d_pad * 2 * d_pad * wb   # single-buffered (constant index map)
    b_bytes = 2 * d_pad * 4            # single-buffered f32 bias row

    def resident_bytes(tm_):
        return (w_bytes + b_bytes
                + 2 * tm_ * d_pad * xb        # x tile (double buffered)
                + 2 * tm_ * d_pad * ob        # out tile (double buffered)
                + tm_ * 2 * d_pad * 4)        # f32 pre-activation temps

    def streamed_bytes(tm_, tk_):
        return (2 * tk_ * 2 * d_pad * wb + b_bytes
                + 2 * tm_ * d_pad * xb        # x rows (residual + LHS K-slices)
                + 2 * tm_ * d_pad * ob        # out tile
                + tm_ * 2 * d_pad * 4         # f32 accumulator scratch
                + tm_ * 2 * d_pad * 4)        # epilogue temps margin

    def pick_tk(tm_):
        best, t = 128, 128
        while t <= d_pad:
            if d_pad % t == 0 and streamed_bytes(tm_, t) <= budget:
                best = t
            t += 128
        return best

    if k_tile is not None:
        tk = min(max(128, (int(k_tile) // 128) * 128), d_pad)
        while d_pad % tk:
            tk -= 128
        resident = (tk == d_pad)
    else:
        resident = resident_bytes(8) <= budget
        tk = d_pad if resident else pick_tk(tm)

    if resident:
        while tm > 8 and resident_bytes(tm) > budget:
            tm = max(8, _round_up(tm // 2, 8))
        vmem_bytes = resident_bytes(tm)
    else:
        while tm > 8 and streamed_bytes(tm, tk) > budget:
            tm = max(8, _round_up(tm // 2, 8))
            if k_tile is None:
                tk = pick_tk(tm)
        vmem_bytes = streamed_bytes(tm, tk)

    n_pad = _round_up(n, tm)
    # Pad only when the shapes require it (no extra HBM passes for clean shapes).
    padded = (n_pad != n) or (d_pad != d)
    x_p = jnp.pad(x2, ((0, n_pad - n), (0, d_pad - d))) if padded else x2

    if resident:
        grid = (n_pad // tm,)
        in_specs = [
            pl.BlockSpec((tm, d_pad), lambda i: (i, 0)),            # x row tile
            pl.BlockSpec((d_pad, 2 * d_pad), lambda i: (0, 0),      # fused W, resident
                         pipeline_mode=pl.Buffered(1)),
            pl.BlockSpec((1, 2 * d_pad), lambda i: (0, 0),          # fused bias
                         pipeline_mode=pl.Buffered(1)),
        ]
        out_specs = pl.BlockSpec((tm, d_pad), lambda i: (i, 0))
        scratch_shapes = []
        kernel = functools.partial(_highway_kernel_resident,
                                   d_pad=d_pad, mm_dtype=mm_dtype)
        dim_sem = ("parallel",)
    else:
        grid = (n_pad // tm, d_pad // tk)
        in_specs = [
            pl.BlockSpec((tm, d_pad), lambda i, k: (i, 0)),         # x rows (once per i)
            pl.BlockSpec((tk, 2 * d_pad), lambda i, k: (k, 0)),     # W K-slab
            pl.BlockSpec((1, 2 * d_pad), lambda i, k: (0, 0),       # fused bias
                         pipeline_mode=pl.Buffered(1)),
        ]
        out_specs = pl.BlockSpec((tm, d_pad), lambda i, k: (i, 0))
        scratch_shapes = [pltpu.VMEM((tm, 2 * d_pad), jnp.float32)]
        kernel = functools.partial(_highway_kernel_ktiled,
                                   d_pad=d_pad, tk=tk, mm_dtype=mm_dtype)
        dim_sem = ("parallel", "arbitrary")

    vmem_limit = int(max(min(vmem_bytes + (8 << 20), int(0.9 * vmem_cap)),
                         16 << 20))

    out = pl.pallas_call(
        kernel,
        out_shape=jax.ShapeDtypeStruct((n_pad, d_pad), x2.dtype),
        grid_spec=pltpu.PrefetchScalarGridSpec(
            num_scalar_prefetch=0,
            grid=grid,
            in_specs=in_specs,
            out_specs=out_specs,
            scratch_shapes=scratch_shapes,
        ),
        compiler_params=pltpu.CompilerParams(
            dimension_semantics=dim_sem,
            vmem_limit_bytes=vmem_limit,
        ),
    )(x_p, w_cat, b_cat)

    if padded:
        out = out[:n, :d]
    return out.reshape(orig_shape)


def highway_forward(x, w_proj, b_proj, w_transform, b_transform, *,
                    row_tile=512, k_tile=None, matmul_dtype=None):
    """Highway forward. x: [..., D]; w_*: [D, D] (PyTorch out x in); b_*: [D]."""
    w_cat, b_cat = prepare_highway_params(w_proj, b_proj, w_transform,
                                          b_transform, matmul_dtype=matmul_dtype)
    return highway_apply(x, w_cat, b_cat, row_tile=row_tile, k_tile=k_tile)


# ---------------------------------------------------------------------------
# Reference / init helpers and demo
# ---------------------------------------------------------------------------

def _highway_reference(x, w_proj, b_proj, w_transform, b_transform):
    proj_gate = jnp.maximum(x @ w_proj.T + b_proj, 0.0)
    t = jax.nn.sigmoid(x @ w_transform.T + b_transform)
    return proj_gate * t + x * (1.0 - t)


def _xavier_uniform(key, shape, dtype=jnp.float32):
    fan_in, fan_out = shape[1], shape[0]
    limit = (6.0 / (fan_in + fan_out)) ** 0.5
    return jax.random.uniform(key, shape, dtype, minval=-limit, maxval=limit)


if __name__ == "__main__":
    key = jax.random.PRNGKey(0)

    # --- Test 1: module-sized demo (batch=2, seq=8, hidden=32), f32 --------
    batch, seq, hidden = 2, 8, 32
    kx, kwp, kbp, kwt = jax.random.split(key, 4)
    x = jax.random.normal(kx, (batch, seq, hidden), dtype=jnp.float32)
    w_proj = _xavier_uniform(kwp, (hidden, hidden))
    bound = 1.0 / (hidden ** 0.5)
    b_proj = jax.random.uniform(kbp, (hidden,), jnp.float32, -bound, bound)
    w_transform = jax.random.uniform(kwt, (hidden, hidden), jnp.float32, -bound, bound)
    b_transform = jnp.full((hidden,), -2.0, dtype=jnp.float32)

    out = highway_forward(x, w_proj, b_proj, w_transform, b_transform)
    jax.block_until_ready(out)
    ref = _highway_reference(x.reshape(-1, hidden), w_proj, b_proj,
                             w_transform, b_transform).reshape(x.shape)
    assert jnp.allclose(out, ref, atol=1e-5, rtol=1e-5), "mismatch (test 1)"

    # --- Test 2: exercise row tiling + K-streaming accumulator path --------
    n2, d2 = 512, 256
    k2 = jax.random.split(jax.random.PRNGKey(0), 8)
    x2 = jax.random.normal(k2[0], (n2, d2), jnp.float32)
    wp2 = _xavier_uniform(k2[1], (d2, d2))
    bnd2 = 1.0 / (d2 ** 0.5)
    bp2 = jax.random.uniform(k2[2], (d2,), jnp.float32, -bnd2, bnd2)
    wt2 = jax.random.uniform(k2[3], (d2, d2), jnp.float32, -bnd2, bnd2)
    bt2 = jnp.full((d2,), -2.0, jnp.float32)

    out2 = highway_forward(x2, wp2, bp2, wt2, bt2, row_tile=128, k_tile=128)
    jax.block_until_ready(out2)
    ref2 = _highway_reference(x2, wp2, bp2, wt2, bt2)
    # split-K accumulation order differs slightly from a single dot
    assert jnp.allclose(out2, ref2, atol=1e-4, rtol=1e-4), "mismatch (test 2)"

    # --- Test 3: bf16 MXU path, pre-fused params + jit (f32 accum/gating) --
    w_cat3, b_cat3 = prepare_highway_params(wp2, bp2, wt2, bt2,
                                            matmul_dtype=jnp.bfloat16)
    apply3 = jax.jit(lambda xx, wc, bc: highway_apply(xx, wc, bc))
    out3 = apply3(x2, w_cat3, b_cat3)
    jax.block_until_ready(out3)
    xb16 = x2.astype(jnp.bfloat16)
    p3 = jnp.dot(xb16, wp2.T.astype(jnp.bfloat16),
                 preferred_element_type=jnp.float32) + bp2
    t3 = jax.nn.sigmoid(jnp.dot(xb16, wt2.T.astype(jnp.bfloat16),
                                preferred_element_type=jnp.float32) + bt2)
    ref3 = jnp.maximum(p3, 0.0) * t3 + x2 * (1.0 - t3)
    assert jnp.allclose(out3, ref3, atol=5e-3, rtol=5e-3), "mismatch (test 3)"

    print("KERNEL_OK")
</pallas_src>

<mosaic_0001>
module attributes {stable_mosaic.version = 11 : i64} {
  func.func @_highway_kernel_resident(%arg0: i32, %arg1: memref<8x128xf32, #tpu.memory_space<vmem>>, %arg2: memref<128x256xf32, #tpu.memory_space<vmem>>, %arg3: memref<1x256xf32, #tpu.memory_space<vmem>>, %arg4: memref<8x128xf32, #tpu.memory_space<vmem>>) attributes {dimension_semantics = [#tpu.dimension_semantics<parallel>], iteration_bounds = array<i64: 2>, scalar_prefetch = 0 : i64, scratch_operands = 0 : i64, tpu.core_type = #tpu.core_type<tc>, window_params = [{transform_indices = @transform_0, window_bounds = array<i64: 8, 128>}, {pipeline_mode = #tpu.pipeline_mode<synchronous>, transform_indices = @transform_1, window_bounds = array<i64: 128, 256>}, {pipeline_mode = #tpu.pipeline_mode<synchronous>, transform_indices = @transform_2, window_bounds = array<i64: 1, 256>}, {transform_indices = @transform_3, window_bounds = array<i64: 8, 128>}]} {
    %c0 = arith.constant 0 : index
    %c0_0 = arith.constant 0 : index
    %0 = vector.load %arg1[%c0, %c0_0] : memref<8x128xf32, #tpu.memory_space<vmem>>, vector<8x128xf32>
    %c0_1 = arith.constant 0 : index
    %c0_2 = arith.constant 0 : index
    %1 = vector.load %arg2[%c0_1, %c0_2] : memref<128x256xf32, #tpu.memory_space<vmem>>, vector<128x256xf32>
    %cst = arith.constant dense<0.000000e+00> : vector<8x256xf32>
    %2 = tpu.matmul %0, %1, %cst {dimension_numbers = #tpu.dot_dimension_numbers<[1], [0], [0], [1], [0, 0, 1, 1], [], []>} : vector<8x128xf32>, vector<128x256xf32>, vector<8x256xf32> -> vector<8x256xf32>
    %c0_3 = arith.constant 0 : index
    %c0_4 = arith.constant 0 : index
    %3 = vector.load %arg3[%c0_3, %c0_4] : memref<1x256xf32, #tpu.memory_space<vmem>>, vector<1x256xf32>
    %4 = vector.broadcast %3 : vector<1x256xf32> to vector<8x256xf32>
    %5 = arith.addf %2, %4 : vector<8x256xf32>
    %6 = vector.extract_strided_slice %5 {offsets = [0, 0], sizes = [8, 128], strides = [1, 1]} : vector<8x256xf32> to vector<8x128xf32>
    %cst_5 = arith.constant 0.000000e+00 : f32
    %7 = vector.broadcast %cst_5 : f32 to vector<8x128xf32>
    %8 = arith.maximumf %6, %7 : vector<8x128xf32>
    %9 = vector.extract_strided_slice %5 {offsets = [0, 128], sizes = [8, 128], strides = [1, 1]} : vector<8x256xf32> to vector<8x128xf32>
    %10 = arith.negf %9 : vector<8x128xf32>
    %11 = math.exp %10 : vector<8x128xf32>
    %cst_6 = arith.constant 1.000000e+00 : f32
    %12 = vector.broadcast %cst_6 : f32 to vector<8x128xf32>
    %13 = arith.addf %12, %11 : vector<8x128xf32>
    %14 = arith.divf %12, %13 : vector<8x128xf32>
    %15 = arith.mulf %8, %14 : vector<8x128xf32>
    %cst_7 = arith.constant 1.000000e+00 : f32
    %16 = vector.broadcast %cst_7 : f32 to vector<8x128xf32>
    %17 = arith.subf %16, %14 : vector<8x128xf32>
    %18 = arith.mulf %0, %17 : vector<8x128xf32>
    %19 = arith.addf %15, %18 : vector<8x128xf32>
    %c0_8 = arith.constant 0 : index
    %c0_9 = arith.constant 0 : index
    %20 = vector.load %arg4[%c0_8, %c0_9] : memref<8x128xf32, #tpu.memory_space<vmem>>, vector<8x128xf32>
    tpu.vector_store %arg4[%c0_8, %c0_9], %19 {strides = array<i32>} : memref<8x128xf32, #tpu.memory_space<vmem>>, vector<8x128xf32>,
    return
  }
  func.func @transform_0(%arg0: i32) -> (i32, i32) {
    %c0_i32 = arith.constant 0 : i32
    %c0_i32_0 = arith.constant 0 : i32
    return %arg0, %c0_i32 : i32, i32
  }
  func.func @transform_1(%arg0: i32) -> (i32, i32) {
    %c0_i32 = arith.constant 0 : i32
    %c0_i32_0 = arith.constant 0 : i32
    %c0_i32_1 = arith.constant 0 : i32
    return %c0_i32, %c0_i32_0 : i32, i32
  }
  func.func @transform_2(%arg0: i32) -> (i32, i32) {
    %c0_i32 = arith.constant 0 : i32
    %c0_i32_0 = arith.constant 0 : i32
    %c0_i32_1 = arith.constant 0 : i32
    return %c0_i32, %c0_i32_0 : i32, i32
  }
  func.func @transform_3(%arg0: i32) -> (i32, i32) {
    %c0_i32 = arith.constant 0 : i32
    %c0_i32_0 = arith.constant 0 : i32
    return %arg0, %c0_i32 : i32, i32
  }
}

</mosaic_0001>

<bundles_post_ra>
// kernel: tpu_custom_call.1
= control target key start
LH: loop header
LB: loop body
LE: loop exit
PB: predicated region body
PF: predicated region fallthrough
CT: control target
= control target key end

     0   :  { %8 = vsyncpa [#allocation3], 0  ;;  %s856_s0 = inlined_call_operand.hbm [shape: f32[16,128], index: 0, kind: input, shape index: {}]   ;;  %s857_s1 = inlined_call_operand.hbm [shape: f32[128,256], index: 1, kind: input, shape index: {}]   ;;  %s858_s2 = inlined_call_operand.hbm [shape: f32[1,256], index: 2, kind: input, shape index: {}]   ;;  %s859_s3 = inlined_call_operand.hbm [shape: f32[16,128], index: 3, kind: output, shape index: {}]  }
   0x1   :  { %10 = vsyncpa [#allocation3 + $0x1], 0 }
   0x2   :  { %11 = vsyncpa [#allocation6], 0 }
   0x3   :  { %12 = vsyncpa [#allocation4], 0 }
   0x4   :  { %14 = vsyncpa [#allocation4 + $0x1], 0  ;;  %s704_s12 = smov 0   ;;  %s706_s13 = smov 0  }
   0x5   :  { %s708_s14 = smov 0   ;;  %s710_s15 = smov 0  }
   0x6 LB: > { %s130_s18 = sshll.u32 %s857_s1, 4  ;;  %s728_s19 = sadd.s32 4294967295, %s678_s15   ;;  %s678_s15 = sphi %s710_s15, %s870_s15   ;;  %s674_s14 = sphi %s708_s14, %s869_s14   ;;  %s670_s13 = sphi %s706_s13, %s868_s13   ;;  %s666_s12 = sphi %s704_s12, %s867_s12   ;;  %s131_s18 = int_to_ptr.hbm [resolvable:$true] %s130_s18 }
   0x7   : > { %p429_p0 = scmp.ge.s32.totalorder %s678_s15, 1  ;;  %p41_p1 = scmp.eq.s32.totalorder %s728_s19, 0 }
   0x8   : > { %p119_p2 = scmp.lt.s32.totalorder %s678_s15, 3  ;;  %s680_s21 = smov [#allocation5]  }
   0x9   : > { %s132_s22 = sshll.u32 %s680_s21, 4  ;;  %s145_s25 = sshll.u32 %s858_s2, 4  ;;  %s133_s22 = int_to_ptr.vmem [resolvable:$true] %s132_s22  ;;  %s146_s25 = int_to_ptr.hbm [resolvable:$true] %s145_s25 }
   0xa   : > { %p733_p3 = pnand %p429_p0, %p119_p2  ;;  %s681_s26 = smov [#allocation7]  }
   0xb   : > { %s147_s27 = sshll.u32 %s681_s26, 4  ;;  %s682_s28 = smov 256   ;;  %s148_s27 = int_to_ptr.vmem [resolvable:$true] %s147_s27 }
   0xc   : > { %p457_p4 = pneg %p733_p3  ;;  %s683_s29 = smov 16  }
   0xd   : > { %s428_s30 = sadd.s32 4294967294, %s678_s15   ;;  %s747_s4 = sadd.s32 1, %s678_s15  }
   0xe   : > { %p458_p6 = pnand %p457_p4, %p41_p1  ;;  %s24_s5 = ssub.s32 %s678_s15, %s747_s4 }
   0xf   : > { %s27_s6 = sadd.s32 1, %s674_s14  ;;  %p25_p7 = scmp.eq.s32.totalorder %s24_s5, 0 }
  0x10   : > { %460 = dma.hbm_to_vmem [thread:$0]  (!%p458_p6), %s131_s18, 4096, %s133_s22, [#allocation6], %s682_s28, %s682_s28, %s683_s29  }
  0x11   : > { %463 = dma.hbm_to_vmem [thread:$0]  (!%p458_p6), %s146_s25, 32, %s148_s27, [#allocation6]  }
  0x12   : > { %p34_p8 = scmp.ne.s32.totalorder %s674_s14, %s670_s13  ;;  %p35_p9 = scmp.eq.s32.totalorder %s678_s15, 0 }
  0x13   : > { %p40_p10 = scmp.ne.s32.totalorder %s670_s13, %s666_s12  ;;  %p106_p13 = scmp.eq.s32.totalorder %s728_s19, 1 }
  0x14   : > { %s758_s7 = scalar_select %p25_p7, %s674_s14, %s27_s6  }
  0x15   : > { %p760_p11 = por %p35_p9, %p34_p8  ;;  %p766_p12 = por %p41_p1, %p40_p10 }
  0x16   : > { %p112_p0 = scmp.eq.s32.totalorder %s428_s30, 1  ;;  %p474_p2 = scmp.lt.s32.totalorder %s678_s15, 2 }
  0x17   : > { %s158_s10 = sand.u32 1, %s674_s14   ;;  %p773_p4 = por %p106_p13, %p34_p8 }
  0x18   : > { %p777_p6 = por %p112_p0, %p40_p10  ;;  %s433_s17 = sshll.u32 %s158_s10, 3 }
  0x19   : > { %s434_s18 = sshll.u32 %s678_s15, 3  ;;  %s162_s24 = scalar_lea.vmem [#allocation2], %s433_s17 }
  0x1a   : > { %s166_s23 = scalar_lea.hbm %s856_s0, %s434_s18  ;;  %s170_s25 = sshll.u32 %s162_s24, 4  ;;  %s171_s25 = int_to_ptr.vmem [resolvable:$true] %s170_s25 }
  0x1b   : > { %s168_s26 = sshll.u32 %s166_s23, 4  ;;  %p787_p7 = pnand %p474_p2, %p760_p11  ;;  %s169_s26 = int_to_ptr.hbm [resolvable:$true] %s168_s26 }
  0x1c   : > { %s159_s28 = scalar_lea.sflag [#allocation3], %s158_s10  ;;  %s578_s29 = sshra.s32 %s169_s26, 4  ;;  %s579_s29 = int_to_ptr.hbm [resolvable:$true] %s578_s29 }
  0x1d   : > { %s580_s30 = scalar_lea.hbm %s579_s29, 8  ;;  %p582_p9 = pneg %p787_p7 }
  0x1e   : > { %p581_p8 = scmp.ne.s32.totalorder %s579_s29, %s580_s30  ;;  %s585_s17 = scalar_lea.hbm %s856_s0, 16 }
  0x1f   : > { %p586_p11 = scmp.lt.s32.totalorder %s579_s29, %s856_s0  ;;  %p587_p0 = scmp.lt.s32.totalorder %s585_s17, %s580_s30 }
  0x20   : > { %p583_p10 = pnand %p582_p9, %p581_p8 }
  0x21   : > { %p588_p2 = por %p587_p0, %p586_p11 }
  0x22   : > { %p584_p13 = pneg %p583_p10 }
  0x24   : > { %p589_p5 = pnand %p588_p2, %p584_p13 }
  0x26   : > { %592 = shalt.err (!%p589_p5)
}
  0x27   : > { %467 = dma.hbm_to_vmem [thread:$0]  (!%p787_p7), %s169_s26, 128, %s171_s25, %s159_s28  }
  0x28   : > { %179 = sbr.rel (%p733_p3) target bundleno = 245 (0xf5), region = 32  ;;  %s804_s10 = sand.u32 (!%p733_p3), 1, %s670_s13  }
  0x29   : > { %s436_s21 = sshll.u32 (!%p733_p3), %s804_s10, 3  ;;  %s182_s22 = scalar_lea.sflag (!%p733_p3), [#allocation3], %s804_s10 }
  0x2a   : > { %s810_s23 = scalar_lea.vmem (!%p733_p3), [#allocation2], %s436_s21 }
  0x2d   : > { %653 = dma.done.wait (%p766_p12), %s182_s22, 128  }
  0x2e   : > { %655 = vsyncadd (%p766_p12), %s182_s22, 4294967168 }
  0x2f   : > { %657 = dma.done.wait (%p41_p1), [#allocation6], 4128  }
  0x30   : > { %659 = vsyncadd (%p41_p1), [#allocation6], 4294963168  ;;  %v251_v0 = vld [vmem:[#allocation5 + $0xf8] sm:$0xff]  ;;  %v249_v1 = vld [vmem:[#allocation5 + $0xe8] sm:$0xff]  ;;  %s442_s20 = sshll.u32 %s728_s19, 3  ;;  %s218_s26 = scalar_lea.vmem [#allocation8], %s436_s21 }
  0x31   : > { %278 = vmatpush.msra.mxu1 %v251_v0  ;;  %v247_v2 = vld [vmem:[#allocation5 + $0xd8] sm:$0xff]  ;;  %v245_v3 = vld [vmem:[#allocation5 + $0xc8] sm:$0xff]  ;;  %v250_v4 = vld [vmem:[#allocation5 + $0xf0] sm:$0xff]  ;;  %s334_s25 = scalar_lea.hbm %s859_s3, %s442_s20  ;;  %s336_s27 = sshll.u32 %s218_s26, 4  ;;  %s337_s27 = int_to_ptr.vmem [resolvable:$true] %s336_s27 }
  0x32   : > { %258 = vmatpush.msra.mxu0 %v250_v4  ;;  %v248_v5 = vld [vmem:[#allocation5 + $0xe0] sm:$0xff]  ;;  %v243_v6 = vld [vmem:[#allocation5 + $0xb8] sm:$0xff]  ;;  %v246_v7 = vld [vmem:[#allocation5 + $0xd0] sm:$0xff]  ;;  %s338_s28 = sshll.u32 %s334_s25, 4  ;;  %s324_s19 = scalar_lea.sflag [#allocation4], %s804_s10  ;;  %s339_s28 = int_to_ptr.hbm [resolvable:$true] %s338_s28 }
  0x33   : > { %279 = vmatpush.msra.mxu1 %v249_v1  ;;  %v241_v8 = vld [vmem:[#allocation5 + $0xa8] sm:$0xff]  ;;  %v244_v9 = vld [vmem:[#allocation5 + $0xc0] sm:$0xff]  ;;  %v239_v10 = vld [vmem:[#allocation5 + $0x98] sm:$0xff]  ;;  %s622_s29 = sshra.s32 %s339_s28, 4  ;;  %s628_s17 = scalar_lea.hbm %s859_s3, 16  ;;  %s623_s29 = int_to_ptr.hbm [resolvable:$true] %s622_s29 }
  0x34   : > { %259 = vmatpush.msra.mxu0 %v248_v5  ;;  %v242_v11 = vld [vmem:[#allocation5 + $0xb0] sm:$0xff]  ;;  %v237_v12 = vld [vmem:[#allocation5 + $0x88] sm:$0xff]  ;;  %v240_v13 = vld [vmem:[#allocation5 + $0xa0] sm:$0xff]  ;;  %s624_s30 = scalar_lea.hbm %s623_s29, 8  ;;  %p629_p12 = scmp.lt.s32.totalorder %s623_s29, %s859_s3 }
  0x35   : > { %280 = vmatpush.msra.mxu1 %v247_v2  ;;  %v235_v14 = vld [vmem:[#allocation5 + $0x78] sm:$0xff]  ;;  %v238_v15 = vld [vmem:[#allocation5 + $0x90] sm:$0xff]  ;;  %v233_v16 = vld [vmem:[#allocation5 + $0x68] sm:$0xff]  ;;  %p625_p1 = scmp.ne.s32.totalorder %s623_s29, %s624_s30  ;;  %p630_p7 = scmp.lt.s32.totalorder %s628_s17, %s624_s30 }
  0x36   : > { %260 = vmatpush.msra.mxu0 %v246_v7  ;;  %v236_v17 = vld [vmem:[#allocation5 + $0x80] sm:$0xff]  ;;  %v231_v18 = vld [vmem:[#allocation5 + $0x58] sm:$0xff]  ;;  %v234_v19 = vld [vmem:[#allocation5 + $0x70] sm:$0xff] }
  0x37   : > { %281 = vmatpush.msra.mxu1 %v245_v3  ;;  %v229_v20 = vld [vmem:[#allocation5 + $0x48] sm:$0xff]  ;;  %v232_v21 = vld [vmem:[#allocation5 + $0x60] sm:$0xff]  ;;  %v227_v22 = vld [vmem:[#allocation5 + $0x38] sm:$0xff]  ;;  %p626_p3 = pnand %p625_p1, %p773_p4  ;;  %p631_p8 = por %p630_p7, %p629_p12 }
  0x38   : > { %261 = vmatpush.msra.mxu0 %v244_v9  ;;  %v230_v23 = vld [vmem:[#allocation5 + $0x50] sm:$0xff]  ;;  %v225_v24 = vld [vmem:[#allocation5 + $0x28] sm:$0xff]  ;;  %v228_v25 = vld [vmem:[#allocation5 + $0x40] sm:$0xff] }
  0x39   : > { %282 = vmatpush.msra.mxu1 %v243_v6  ;;  %v223_v26 = vld [vmem:[#allocation5 + $0x18] sm:$0xff]  ;;  %v226_v27 = vld [vmem:[#allocation5 + $0x30] sm:$0xff]  ;;  %v221_v28 = vld [vmem:[#allocation5 + $0x8] sm:$0xff]  ;;  %p627_p5 = pneg %p626_p3 }
  0x3a   : > { %262 = vmatpush.msra.mxu0 %v242_v11  ;;  %v224_v29 = vld [vmem:[#allocation5 + $0x20] sm:$0xff]  ;;  %v219_v30 = vld [vmem:[%s810_s23] sm:$0xff] }
  0x3b   : > { %283 = vmatpush.msra.mxu1 %v241_v8  ;;  %v222_v31 = vld [vmem:[#allocation5 + $0x10] sm:$0xff]  ;;  %v220_v32 = vld [vmem:[#allocation5] sm:$0xff]  ;;  %p632_p9 = pnand %p631_p8, %p627_p5 }
  0x3c   : > { %263 = vmatpush.msra.mxu0 %v240_v13  ;;  %v252_v33 = vld [vmem:[#allocation7] sm:$0x3] }
  0x3d   : > { %284 = vmatpush.msra.mxu1 %v239_v10  ;;  %v255_v34 = vperm.slane %v252_v33, 1  ;;  %v254_v41 = vperm.slane %v252_v33, 0 }
  0x3e   : > { %264 = vmatpush.msra.mxu0 %v238_v15 }
  0x3f   : > { %285 = vmatpush.msra.mxu1 %v237_v12 }
  0x40   : > { %265 = vmatpush.msra.mxu0 %v236_v17 }
  0x41   : > { %286 = vmatpush.msra.mxu1 %v235_v14 }
  0x42   : > { %266 = vmatpush.msra.mxu0 %v234_v19 }
  0x43   : > { %287 = vmatpush.msra.mxu1 %v233_v16 }
  0x44   : > { %267 = vmatpush.msra.mxu0 %v232_v21 }
  0x45   : > { %288 = vmatpush.msra.mxu1 %v231_v18 }
  0x46   : > { %268 = vmatpush.msra.mxu0 %v230_v23 }
  0x47   : > { %289 = vmatpush.msra.mxu1 %v229_v20 }
  0x48   : > { %269 = vmatpush.msra.mxu0 %v228_v25 }
  0x49   : > { %290 = vmatpush.msra.mxu1 %v227_v22 }
  0x4a   : > { %270 = vmatpush.msra.mxu0 %v226_v27 }
  0x4b   : > { %291 = vmatpush.msra.mxu1 %v225_v24 }
  0x4c   : > { %271 = vmatpush.msra.mxu0 %v224_v29 }
  0x4d   : > { %292 = vmatpush.msra.mxu1 %v223_v26 }
  0x4e   : > { %272 = vmatpush.msra.mxu0 %v222_v31 }
  0x4f   : > { %293 = vmatpush.msra.mxu1 %v221_v28 }
  0x50   : > { %294 = vmatmul.f32.vlgmr.msra.gmra.mxu1 %v219_v30  ;;  %273 = vmatpush.msra.mxu0 %v220_v32 }
  0x51   : > { %274 = vmatmul.f32.vlgmr.msra.gmra.mxu0 %v219_v30 }
  0xcd   : > { %v295_v35 = vpop.f32.mrf.mxu1 }
  0xce   : > { %v296_v36 = vadd.f32 %v295_v35, %v255_v34  ;;  %v275_v43 = vpop.f32.mrf.mxu0 }
  0xcf   : > { %v276_v46 = vadd.f32 %v275_v43, %v254_v41 }
  0xd0   : > { %v440_v37 = vmul.f32 -1.442695, %v296_v36 }
  0xd1   : > { %v298_v51 = vmax.f32 %v276_v46, 0.0 }
  0xd2   : > { %514 = vpow2.f32 %v440_v37 }
  0xd8   : > { %v515_v38 = vpop.eup %514 }
  0xd9   : > { %v302_v39 = vadd.f32 1.0, %v515_v38 }
  0xdb   : > { %516 = vrcp.f32 %v302_v39  ;;  %v314_v45 = vand.u32 2147483648, %v302_v39  ;;  %v312_v48 = vand.u32 2147483647, %v302_v39  ;;  %vm308_vm1 = vweird.f32 %v302_v39 }
  0xdd   : > { %v315_v50 = vor.u32 1.1754944e-38, %v314_v45  ;;  %vm313_vm3 = vcmp.eq.f32.partialorder %v312_v48, 8.507059e+37 }
  0xe1   : > { %v517_v40 = vpop.eup %516 }
  0xe2   : > { %v304_v42 = vmul.f32 %v517_v40, %v302_v39  ;;  %vm309_vm0 = vweird.f32 %v517_v40 }
  0xe3   : > { %vm310_vm2 = vmor %vm308_vm1, %vm309_vm0 }
  0xe4   : > { %v305_v44 = vsub.f32 1.0, %v304_v42 }
  0xe6   : > { %v306_v47 = vmul.f32 %v517_v40, %v305_v44 }
  0xe8   : > { %v307_v49 = vadd.f32 %v517_v40, %v306_v47 }
  0xea   : > { %v311_v52 = vsel %vm310_vm2, %v517_v40, %v307_v49 }
  0xeb   : > { %v316_v53 = vsel %vm313_vm3, %v315_v50, %v311_v52 }
  0xec   : > { %v319_v54 = vsub.f32 1.0, %v316_v53  ;;  %v318_v55 = vmul.f32 %v316_v53, %v298_v51 }
  0xee   : > { %v320_v56 = vmul.f32 %v319_v54, %v219_v30 }
  0xf0   : > { %v321_v57 = vadd.f32 %v320_v56, %v318_v55 }
  0xf2   : > { %322 = vst [vmem:[%s218_s26] sm:$0xff] %v321_v57 }
  0xf3   : > { %635 = shalt.err (!%p632_p9)
}
  0xf4   : > { %455 = dma.vmem_to_hbm [thread:$0]  (%p773_p4), %s337_s27, 128, %s339_s28, %s324_s19  }
  0xf5 PF: > { %s350_s10 = sand.u32 1, %s666_s12   ;;  %p866_p10 = scmp.ge.s32.totalorder %s678_s15, 2 }
  0xf6   : > { %s351_s21 = scalar_lea.sflag [#allocation4], %s350_s10 }
  0xf7   : > { %p469_p13 = pnand %p866_p10, %p777_p6 }
  0xf9   : > { %p470_p11 = pneg %p469_p13 }
  0xfb   : > { %661 = dma.done.wait (%p470_p11), %s351_s21, 128  }
  0xfc   : > { %663 = vsyncadd (%p470_p11), %s351_s21, 4294967168  ;;  %p17_p0 = scmp.ge.s32.totalorder %s747_s4, 4   ;;  %s867_s12 = smov %s670_s13 }
  0xfd   : > { %s868_s13 = smov %s674_s14  ;;  %s869_s14 = smov %s758_s7 }
  0xfe   : > { %s870_s15 = smov %s747_s4  ;;  %19 = sbr.rel (!%p17_p0) target bundleno = 6 (0x6), region = 85 }
 0x103   :  { %357 = vsyncpa [#allocation3], 1 }
 0x104   :  { %359 = vsyncpa [#allocation3 + $0x1], 1 }
 0x105   :  { %360 = vsyncpa [#allocation6], 1 }
 0x106   :  { %361 = vsyncpa [#allocation4], 1 }
 0x107   :  { %363 = vsyncpa [#allocation4 + $0x1], 1 }

</bundles_post_ra>
